<compile_context>
chip_gen: v7x
topology: tpu7x:2x2x1
jax: 0.10.0
libtpu: 0.0.40
codegen_flags: <defaults>
</compile_context>

<pallas_src>
import jax
import jax.numpy as jnp
from jax.experimental import pallas as pl
from jax.experimental.pallas import tpu as pltpu


def _round_up(x, m):
    return (x + m - 1) // m * m


def _vmem_cap_bytes():
    """Generation-dependent scoped-VMEM cap (leaves headroom below physical)."""
    try:
        kind = jax.devices()[0].device_kind.lower()
    except Exception:
        kind = ""
    if "v7" in kind:
        return 48 * 1024 * 1024            # v7x: 64 MiB physical -> leave headroom
    if "v5" in kind or "v6" in kind:
        return 100 * 1024 * 1024           # v5e/v6e: 128 MiB physical
    return 48 * 1024 * 1024                # unknown generation: be conservative


# ----------------------------- kernels ---------------------------------------

def _mlp_resident_kernel(x_ref, wfc_ref, bfc_ref, wproj_ref, bproj_ref, o_ref):
    # Full weights resident in VMEM (constant index_map => fetched once).
    # x_ref: (tm, Dp) input dtype; wfc_ref: (Dp, Hp) bf16; bfc_ref: (1, Hp) f32
    # wproj_ref: (Hp, Dp) bf16; bproj_ref: (1, Dp) f32; o_ref: (tm, Dp) x.dtype
    xb = x_ref[...].astype(jnp.bfloat16)                  # in-kernel cast
    h = jnp.dot(xb, wfc_ref[...], preferred_element_type=jnp.float32)
    h = h + bfc_ref[...]
    acts = h * jax.nn.sigmoid(1.702 * h)                  # quick_gelu, fp32 (v5e-safe)
    # Dropout(p=0.0) is the identity.
    out = jnp.dot(acts.astype(jnp.bfloat16), wproj_ref[...],
                  preferred_element_type=jnp.float32) + bproj_ref[...]
    o_ref[...] = out.astype(o_ref.dtype)


def _mlp_chunked_kernel(x_ref, wfc_ref, bfc_ref, wproj_ref, bproj_ref, o_ref,
                        acc_ref):
    # Fallback: H processed in th-chunks on an "arbitrary" grid axis with an
    # fp32 VMEM accumulator resident across j.
    j = pl.program_id(1)
    xb = x_ref[...].astype(jnp.bfloat16)
    h = jnp.dot(xb, wfc_ref[...], preferred_element_type=jnp.float32)
    h = h + bfc_ref[...]
    acts = h * jax.nn.sigmoid(1.702 * h)
    part = jnp.dot(acts.astype(jnp.bfloat16), wproj_ref[...],
                   preferred_element_type=jnp.float32)

    @pl.when(j == 0)
    def _():
        # Fold b_proj into the first partial sum: no zero-fill, no extra RMW.
        acc_ref[...] = part + bproj_ref[...]

    @pl.when(j != 0)
    def _():
        acc_ref[...] += part

    @pl.when(j == pl.num_programs(1) - 1)
    def _():
        o_ref[...] = acc_ref[...].astype(o_ref.dtype)


# ----------------------------- wrapper ----------------------------------------

def mlp_pallas(x, w_fc, b_fc, w_proj, b_proj, *, tm=512, th=1024):
    """ViT MLP forward.

    x: [B, S, D]; w_fc: [D, H]; b_fc: [H]; w_proj: [H, D]; b_proj: [D].
    Weights are stored transposed w.r.t. PyTorch nn.Linear (i.e. weight.T).
    """
    B, S, D = x.shape
    H = w_fc.shape[1]
    M = B * S
    out_dtype = x.dtype
    x_bytes = x.dtype.itemsize
    o_bytes = jnp.dtype(out_dtype).itemsize

    Dp = _round_up(D, 128)
    Hp128 = _round_up(H, 128)
    tm_max = _round_up(M, 8)
    cap = _vmem_cap_bytes()

    # ---- VMEM footprint models (double buffering counted exactly once) ------
    def resident_bytes(t):
        return (2 * t * Dp * x_bytes          # x tile
                + 2 * Dp * Hp128 * 2          # W_fc (bf16)
                + 2 * Hp128 * 4               # b_fc (f32)
                + 2 * Hp128 * Dp * 2          # W_proj (bf16)
                + 2 * Dp * 4                  # b_proj (f32)
                + 2 * t * Dp * o_bytes        # out tile
                + t * Hp128 * 4               # fp32 hidden intermediate
                + t * Hp128 * 2)              # bf16 acts for 2nd matmul

    def chunked_bytes(t, c):
        return (2 * t * Dp * x_bytes
                + 2 * Dp * c * 2
                + 2 * c * 4
                + 2 * c * Dp * 2
                + 2 * Dp * 4
                + 2 * t * Dp * o_bytes
                + t * Dp * 4                  # fp32 accumulator scratch
                + t * c * 4                   # fp32 hidden chunk
                + t * c * 2)                  # bf16 acts chunk

    def tm_candidates(start):
        c = max(8, min(_round_up(start, 8), tm_max))
        cands = []
        while True:
            cands.append(c)
            if c <= 8:
                break
            c = max(8, _round_up(c // 2, 8))
        return cands

    def th_candidates(start):
        c = max(128, min(_round_up(start, 128), Hp128))
        cands = []
        while True:
            cands.append(c)
            if c <= 128:
                break
            c = max(128, _round_up(c // 2, 128))
        return cands

    # ---- pick a plan: prefer weights-resident (weights DMA'd once) ----------
    plan = None
    for t in tm_candidates(tm):
        need = resident_bytes(t)
        if need * 5 // 4 <= cap:
            plan = ("resident", t, None, need)
            break
    if plan is None:
        for t in tm_candidates(tm):
            for c in th_candidates(th):
                need = chunked_bytes(t, c)
                if need * 5 // 4 <= cap:
                    plan = ("chunked", t, c, need)
                    break
            if plan is not None:
                break
    if plan is None:  # last resort: smallest tiles
        t = tm_candidates(8)[-1]
        plan = ("chunked", t, 128, chunked_bytes(t, 128))

    mode, tm, th, need_bytes = plan
    Mp = _round_up(M, tm)
    Hp = Hp128 if mode == "resident" else _round_up(H, th)

    # ---- prepare operands (skip padding passes when shapes already align) ---
    def prep(a, shape, dtype):
        if a.shape == tuple(shape):
            return a.astype(dtype)            # no-op if already in dtype
        out = jnp.zeros(shape, dtype)
        return out.at[tuple(slice(0, s) for s in a.shape)].set(a.astype(dtype))

    wfc = prep(w_fc, (Dp, Hp), jnp.bfloat16)
    wproj = prep(w_proj, (Hp, Dp), jnp.bfloat16)
    bfc = prep(b_fc.reshape(1, H), (1, Hp), jnp.float32)
    bproj = prep(b_proj.reshape(1, D), (1, Dp), jnp.float32)

    x2 = x.reshape(M, D)
    if (Mp, Dp) != (M, D):
        x2 = jnp.zeros((Mp, Dp), x.dtype).at[:M, :D].set(x2)

    vmem_limit = int(min(cap, max(need_bytes * 5 // 4, 32 * 1024 * 1024)))

    cost = pl.CostEstimate(
        flops=4 * M * D * H,                   # two matmuls
        transcendentals=M * H,                 # sigmoid in quick_gelu
        bytes_accessed=(M * D * x_bytes + 2 * D * H * 2 + 2 * H * D
                        + (H + D) * 4 + M * D * o_bytes),
    )

    if mode == "resident":
        out = pl.pallas_call(
            _mlp_resident_kernel,
            out_shape=jax.ShapeDtypeStruct((Mp, Dp), out_dtype),
            grid_spec=pltpu.PrefetchScalarGridSpec(
                num_scalar_prefetch=0,
                grid=(Mp // tm,),
                in_specs=[
                    pl.BlockSpec((tm, Dp), lambda i: (i, 0)),   # x rows
                    pl.BlockSpec((Dp, Hp), lambda i: (0, 0)),   # W_fc (resident)
                    pl.BlockSpec((1, Hp), lambda i: (0, 0)),    # b_fc (resident)
                    pl.BlockSpec((Hp, Dp), lambda i: (0, 0)),   # W_proj (resident)
                    pl.BlockSpec((1, Dp), lambda i: (0, 0)),    # b_proj (resident)
                ],
                out_specs=pl.BlockSpec((tm, Dp), lambda i: (i, 0)),
            ),
            compiler_params=pltpu.CompilerParams(
                dimension_semantics=("parallel",),
                vmem_limit_bytes=vmem_limit,
            ),
            cost_estimate=cost,
        )(x2, wfc, bfc, wproj, bproj)
    else:
        out = pl.pallas_call(
            _mlp_chunked_kernel,
            out_shape=jax.ShapeDtypeStruct((Mp, Dp), out_dtype),
            grid_spec=pltpu.PrefetchScalarGridSpec(
                num_scalar_prefetch=0,
                grid=(Mp // tm, Hp // th),
                in_specs=[
                    pl.BlockSpec((tm, Dp), lambda i, j: (i, 0)),   # x rows
                    pl.BlockSpec((Dp, th), lambda i, j: (0, j)),   # W_fc H-chunk
                    pl.BlockSpec((1, th), lambda i, j: (0, j)),    # b_fc H-chunk
                    pl.BlockSpec((th, Dp), lambda i, j: (j, 0)),   # W_proj H-chunk
                    pl.BlockSpec((1, Dp), lambda i, j: (0, 0)),    # b_proj
                ],
                out_specs=pl.BlockSpec((tm, Dp), lambda i, j: (i, 0)),
                scratch_shapes=[pltpu.VMEM((tm, Dp), jnp.float32)],
            ),
            compiler_params=pltpu.CompilerParams(
                dimension_semantics=("parallel", "arbitrary"),
                vmem_limit_bytes=vmem_limit,
            ),
            cost_estimate=cost,
        )(x2, wfc, bfc, wproj, bproj)

    if (Mp, Dp) != (M, D):
        out = out[:M, :D]
    return out.reshape(B, S, D)


if __name__ == "__main__":
    # Small ViT-like config: d_model=32, mlp_mult=4 -> hidden=128, batch=2, seq=8
    B, S, D, MULT = 2, 8, 32, 4
    H = D * MULT

    key = jax.random.PRNGKey(0)
    kx, kw1, kb1, kw2, kb2 = jax.random.split(key, 5)

    x = jax.random.normal(kx, (B, S, D), dtype=jnp.float32)
    # PyTorch Linear shapes are c_fc.weight (H, D), c_proj.weight (D, H);
    # stored transposed here for row-major MXU matmuls.
    w_fc = jax.random.normal(kw1, (D, H), dtype=jnp.float32) * 0.02
    b_fc = jax.random.normal(kb1, (H,), dtype=jnp.float32) * 0.02
    w_proj = jax.random.normal(kw2, (H, D), dtype=jnp.float32) * 0.02
    b_proj = jax.random.normal(kb2, (D,), dtype=jnp.float32) * 0.02

    out = mlp_pallas(x, w_fc, b_fc, w_proj, b_proj)
    out = jax.block_until_ready(out)

    # Pure-JAX fp32 reference (kernel uses bf16 MXU operands -> loose tolerance).
    h_ref = x.reshape(B * S, D) @ w_fc + b_fc
    a_ref = h_ref * jax.nn.sigmoid(1.702 * h_ref)
    o_ref = (a_ref @ w_proj + b_proj).reshape(B, S, D)
    assert out.shape == o_ref.shape
    assert jnp.allclose(out, o_ref, atol=1e-2, rtol=1e-2)

    print("KERNEL_OK")
</pallas_src>

<mosaic_0001>
module attributes {stable_mosaic.version = 11 : i64} {
  func.func @_mlp_resident_kernel(%arg0: i32, %arg1: memref<16x128xf32, #tpu.memory_space<vmem>>, %arg2: memref<128x128xbf16, #tpu.memory_space<vmem>>, %arg3: memref<1x128xf32, #tpu.memory_space<vmem>>, %arg4: memref<128x128xbf16, #tpu.memory_space<vmem>>, %arg5: memref<1x128xf32, #tpu.memory_space<vmem>>, %arg6: memref<16x128xf32, #tpu.memory_space<vmem>>) attributes {dimension_semantics = [#tpu.dimension_semantics<parallel>], iteration_bounds = array<i64: 1>, scalar_prefetch = 0 : i64, scratch_operands = 0 : i64, tpu.core_type = #tpu.core_type<tc>, window_params = [{transform_indices = @transform_0, window_bounds = array<i64: 16, 128>}, {pipeline_mode = #tpu.pipeline_mode<synchronous>, transform_indices = @transform_1, window_bounds = array<i64: 128, 128>}, {pipeline_mode = #tpu.pipeline_mode<synchronous>, transform_indices = @transform_2, window_bounds = array<i64: 1, 128>}, {pipeline_mode = #tpu.pipeline_mode<synchronous>, transform_indices = @transform_3, window_bounds = array<i64: 128, 128>}, {pipeline_mode = #tpu.pipeline_mode<synchronous>, transform_indices = @transform_4, window_bounds = array<i64: 1, 128>}, {transform_indices = @transform_5, window_bounds = array<i64: 16, 128>}]} {
    %c0 = arith.constant 0 : index
    %c0_0 = arith.constant 0 : index
    %0 = vector.load %arg1[%c0, %c0_0] : memref<16x128xf32, #tpu.memory_space<vmem>>, vector<16x128xf32>
    %1 = arith.truncf %0 : vector<16x128xf32> to vector<16x128xbf16>
    %c0_1 = arith.constant 0 : index
    %c0_2 = arith.constant 0 : index
    %2 = vector.load %arg2[%c0_1, %c0_2] : memref<128x128xbf16, #tpu.memory_space<vmem>>, vector<128x128xbf16>
    %cst = arith.constant dense<0.000000e+00> : vector<16x128xf32>
    %3 = tpu.matmul %1, %2, %cst {dimension_numbers = #tpu.dot_dimension_numbers<[1], [0], [0], [1], [0, 0, 1, 1], [], []>} : vector<16x128xbf16>, vector<128x128xbf16>, vector<16x128xf32> -> vector<16x128xf32>
    %c0_3 = arith.constant 0 : index
    %c0_4 = arith.constant 0 : index
    %4 = vector.load %arg3[%c0_3, %c0_4] : memref<1x128xf32, #tpu.memory_space<vmem>>, vector<1x128xf32>
    %5 = vector.broadcast %4 : vector<1x128xf32> to vector<16x128xf32>
    %6 = arith.addf %3, %5 : vector<16x128xf32>
    %cst_5 = arith.constant 1.702000e+00 : f32
    %7 = vector.broadcast %cst_5 : f32 to vector<16x128xf32>
    %8 = arith.mulf %7, %6 : vector<16x128xf32>
    %9 = arith.negf %8 : vector<16x128xf32>
    %10 = math.exp %9 : vector<16x128xf32>
    %cst_6 = arith.constant 1.000000e+00 : f32
    %11 = vector.broadcast %cst_6 : f32 to vector<16x128xf32>
    %12 = arith.addf %11, %10 : vector<16x128xf32>
    %13 = arith.divf %11, %12 : vector<16x128xf32>
    %14 = arith.mulf %6, %13 : vector<16x128xf32>
    %15 = arith.truncf %14 : vector<16x128xf32> to vector<16x128xbf16>
    %c0_7 = arith.constant 0 : index
    %c0_8 = arith.constant 0 : index
    %16 = vector.load %arg4[%c0_7, %c0_8] : memref<128x128xbf16, #tpu.memory_space<vmem>>, vector<128x128xbf16>
    %cst_9 = arith.constant dense<0.000000e+00> : vector<16x128xf32>
    %17 = tpu.matmul %15, %16, %cst_9 {dimension_numbers = #tpu.dot_dimension_numbers<[1], [0], [0], [1], [0, 0, 1, 1], [], []>} : vector<16x128xbf16>, vector<128x128xbf16>, vector<16x128xf32> -> vector<16x128xf32>
    %c0_10 = arith.constant 0 : index
    %c0_11 = arith.constant 0 : index
    %18 = vector.load %arg5[%c0_10, %c0_11] : memref<1x128xf32, #tpu.memory_space<vmem>>, vector<1x128xf32>
    %19 = vector.broadcast %18 : vector<1x128xf32> to vector<16x128xf32>
    %20 = arith.addf %17, %19 : vector<16x128xf32>
    %c0_12 = arith.constant 0 : index
    %c0_13 = arith.constant 0 : index
    %21 = vector.load %arg6[%c0_12, %c0_13] : memref<16x128xf32, #tpu.memory_space<vmem>>, vector<16x128xf32>
    tpu.vector_store %arg6[%c0_12, %c0_13], %20 {strides = array<i32>} : memref<16x128xf32, #tpu.memory_space<vmem>>, vector<16x128xf32>,
    return
  }
  func.func @transform_0(%arg0: i32) -> (i32, i32) {
    %c0_i32 = arith.constant 0 : i32
    %c0_i32_0 = arith.constant 0 : i32
    return %arg0, %c0_i32 : i32, i32
  }
  func.func @transform_1(%arg0: i32) -> (i32, i32) {
    %c0_i32 = arith.constant 0 : i32
    %c0_i32_0 = arith.constant 0 : i32
    %c0_i32_1 = arith.constant 0 : i32
    return %c0_i32, %c0_i32_0 : i32, i32
  }
  func.func @transform_2(%arg0: i32) -> (i32, i32) {
    %c0_i32 = arith.constant 0 : i32
    %c0_i32_0 = arith.constant 0 : i32
    %c0_i32_1 = arith.constant 0 : i32
    return %c0_i32, %c0_i32_0 : i32, i32
  }
  func.func @transform_3(%arg0: i32) -> (i32, i32) {
    %c0_i32 = arith.constant 0 : i32
    %c0_i32_0 = arith.constant 0 : i32
    %c0_i32_1 = arith.constant 0 : i32
    return %c0_i32, %c0_i32_0 : i32, i32
  }
  func.func @transform_4(%arg0: i32) -> (i32, i32) {
    %c0_i32 = arith.constant 0 : i32
    %c0_i32_0 = arith.constant 0 : i32
    %c0_i32_1 = arith.constant 0 : i32
    return %c0_i32, %c0_i32_0 : i32, i32
  }
  func.func @transform_5(%arg0: i32) -> (i32, i32) {
    %c0_i32 = arith.constant 0 : i32
    %c0_i32_0 = arith.constant 0 : i32
    return %arg0, %c0_i32 : i32, i32
  }
}

</mosaic_0001>

<bundles_post_ra>
// kernel: tpu_custom_call.1
= control target key start
LH: loop header
LB: loop body
LE: loop exit
PB: predicated region body
PF: predicated region fallthrough
CT: control target
= control target key end

     0   :  { %10 = vsyncpa [#allocation3], 0  ;;  %s639_s0 = inlined_call_operand.hbm [shape: f32[16,128], index: 0, kind: input, shape index: {}]   ;;  %s640_s1 = inlined_call_operand.hbm [shape: bf16[128,128], index: 1, kind: input, shape index: {}]   ;;  %s641_s2 = inlined_call_operand.vmem [shape: f32[1,128], index: 2, kind: input, shape index: {}]   ;;  %s642_s3 = inlined_call_operand.hbm [shape: bf16[128,128], index: 3, kind: input, shape index: {}]   ;;  %s643_s4 = inlined_call_operand.vmem [shape: f32[1,128], index: 4, kind: input, shape index: {}]   ;;  %s644_s5 = inlined_call_operand.hbm [shape: f32[16,128], index: 5, kind: output, shape index: {}]  }
   0x1   :  { %11 = vsyncpa [#allocation6], 0 }
   0x2   :  { %12 = vsyncpa [#allocation4], 0  ;;  %s533_s18 = smov [#allocation5]   ;;  %s439_s22 = scalar_lea.hbm %s640_s1, 1024 }
   0x3   :  { %s30_s19 = sshll.u32 %s533_s18, 4  ;;  %p440_p0 = scmp.ne.s32.totalorder %s640_s1, %s439_s22  ;;  %s31_s19 = int_to_ptr.vmem [resolvable:$true] %s30_s19 }
   0x4   :  { %p443_p1 = scmp.lt.u32.totalorder %s439_s22, %s640_s1 }
   0x6   :  { %p445_p2 = pnand %p443_p1, %p440_p0 }
   0x8   :  { %448 = shalt.err (!%p445_p2)
}
   0x9   :  { %s449_s27 = scalar_lea.vmem %s31_s19, 1024  ;;  %p454_p4 = scmp.lt.s32.totalorder %s31_s19, %s31_s19 }
   0xa   :  { %p450_p3 = scmp.ne.s32.totalorder %s31_s19, %s449_s27  ;;  %p455_p5 = scmp.lt.s32.totalorder %s449_s27, %s449_s27 }
   0xc   :  { %p456_p6 = por %p455_p5, %p454_p4 }
   0xe   :  { %p457_p7 = pnand %p456_p6, %p450_p3 }
  0x10   :  { %460 = shalt.err (!%p457_p7)
}
  0x11   :  { %s534_s28 = smov 64   ;;  %s535_s29 = smov 4  }
  0x12   :  { %36 = dma.hbm_to_vmem [thread:$0]  %s640_s1, 1024, %s31_s19, [#allocation6], %s534_s28, %s534_s28, %s535_s29  }
  0x13   :  { %s536_s7 = smov [#allocation2]   ;;  %s461_s11 = scalar_lea.hbm %s639_s0, 256 }
  0x14   :  { %s18_s8 = sshll.u32 %s536_s7, 4  ;;  %p462_p8 = scmp.ne.s32.totalorder %s639_s0, %s461_s11  ;;  %s19_s8 = int_to_ptr.vmem [resolvable:$true] %s18_s8 }
  0x15   :  { %p465_p9 = scmp.lt.u32.totalorder %s461_s11, %s639_s0 }
  0x17   :  { %p467_p10 = pnand %p465_p9, %p462_p8 }
  0x19   :  { %470 = shalt.err (!%p467_p10)
}
  0x1a   :  { %s471_s16 = scalar_lea.vmem %s19_s8, 256  ;;  %p476_p12 = scmp.lt.s32.totalorder %s19_s8, %s19_s8 }
  0x1b   :  { %p472_p11 = scmp.ne.s32.totalorder %s19_s8, %s471_s16  ;;  %p477_p13 = scmp.lt.s32.totalorder %s471_s16, %s471_s16 }
  0x1d   :  { %p478_p0 = por %p477_p13, %p476_p12 }
  0x1f   :  { %p479_p1 = pnand %p478_p0, %p472_p11 }
  0x21   :  { %482 = shalt.err (!%p479_p1)
}
  0x22   :  { %s537_s1 = smov 128   ;;  %s538_s17 = smov 8  }
  0x23   :  { %24 = dma.hbm_to_vmem [thread:$0]  %s639_s0, 256, %s19_s8, [#allocation3], %s537_s1, %s537_s1, %s538_s17  }
  0x24   :  { %s539_s20 = smov [#allocation7]   ;;  %s483_s24 = scalar_lea.hbm %s642_s3, 1024 }
  0x25   :  { %s44_s21 = sshll.u32 %s539_s20, 4  ;;  %p484_p2 = scmp.ne.s32.totalorder %s642_s3, %s483_s24  ;;  %s45_s21 = int_to_ptr.vmem [resolvable:$true] %s44_s21 }
  0x26   :  { %p487_p3 = scmp.lt.u32.totalorder %s483_s24, %s642_s3 }
  0x28   :  { %p489_p4 = pnand %p487_p3, %p484_p2 }
  0x2a   :  { %492 = shalt.err (!%p489_p4)
}
  0x2b   :  { %s493_s6 = scalar_lea.vmem %s45_s21, 1024  ;;  %p498_p6 = scmp.lt.s32.totalorder %s45_s21, %s45_s21 }
  0x2c   :  { %p494_p5 = scmp.ne.s32.totalorder %s45_s21, %s493_s6  ;;  %p499_p7 = scmp.lt.s32.totalorder %s493_s6, %s493_s6 }
  0x2e   :  { %p500_p8 = por %p499_p7, %p498_p6 }
  0x30   :  { %p501_p9 = pnand %p500_p8, %p494_p5 }
  0x32   :  { %504 = shalt.err (!%p501_p9)
}
  0x33   :  { %50 = dma.hbm_to_vmem [thread:$0]  %s642_s3, 1024, %s45_s21, [#allocation6], %s534_s28, %s534_s28, %s535_s29  }
  0x34   :  { %527 = dma.done.wait [#allocation3], 256  }
  0x35   :  { %528 = vsyncadd [#allocation3], 4294967040 }
  0x36   :  { %529 = dma.done.wait [#allocation6], 2048  }
  0x37   :  { %530 = vsyncadd [#allocation6], 4294965248  ;;  %v540_v0 = vmov 0.0   ;;  %vm541_vm0 = vmmov 0   ;;  %v415_v1 = vld [vmem:[#allocation5] sm:$0xff]   ;;  %v416_v2 = vld [vmem:[#allocation5 + $0x8] sm:$0xff]  }
  0x38   :  { %365 = vmatprep.subr.bf16.mxu0 %v540_v0  ;;  %381 = vmatprep.mubr.msk.bf16.mxu0 %vm541_vm0, %v540_v0  ;;  %v417_v3 = vld [vmem:[#allocation5 + $0x10] sm:$0xff]   ;;  %v418_v4 = vld [vmem:[#allocation5 + $0x18] sm:$0xff]   ;;  %v419_v5 = vld [vmem:[#allocation5 + $0x20] sm:$0xff]   ;;  %s542_s8 = smov [#allocation8]  }
  0x39   :  { %385 = vmatprep.subr.bf16.mxu1 %v540_v0  ;;  %401 = vmatprep.mubr.msk.bf16.mxu1 %vm541_vm0, %v540_v0  ;;  %v420_v6 = vld [vmem:[#allocation5 + $0x28] sm:$0xff]   ;;  %v421_v7 = vld [vmem:[#allocation5 + $0x30] sm:$0xff]   ;;  %v422_v8 = vld [vmem:[#allocation5 + $0x38] sm:$0xff]   ;;  %s314_s9 = sshll.u32 %s542_s8, 4  ;;  %s315_s9 = int_to_ptr.vmem [resolvable:$true] %s314_s9 }
  0x3a   :  { %366 = vmatpush3.bf16.msra.mxu0 %v415_v1  ;;  %v63_v9 = vld [vmem:[#allocation2] sm:$0xff]  ;;  %v64_v10 = vld [vmem:[#allocation2 + $0x8] sm:$0xff]  ;;  %v423_v12 = vld [vmem:[#allocation7] sm:$0xff]   ;;  %s505_s10 = scalar_lea.vmem %s315_s9, 256  ;;  %p510_p11 = scmp.lt.s32.totalorder %s315_s9, %s315_s9 }
  0x3b   :  { %367 = vmatprep.subr.bf16.mxu0 %v540_v0  ;;  %v65_v11 = vpack.c.bf16 %v64_v10, %v63_v9  ;;  %386 = vmatpush3.bf16.msra.mxu1 %v423_v12  ;;  %v424_v13 = vld [vmem:[#allocation7 + $0x8] sm:$0xff]   ;;  %v425_v14 = vld [vmem:[#allocation7 + $0x10] sm:$0xff]   ;;  %v426_v15 = vld [vmem:[#allocation7 + $0x18] sm:$0xff]   ;;  %p506_p10 = scmp.ne.s32.totalorder %s315_s9, %s505_s10  ;;  %p511_p12 = scmp.lt.s32.totalorder %s505_s10, %s505_s10 }
  0x3c   :  { %387 = vmatprep.subr.bf16.mxu1 %v540_v0  ;;  %v427_v16 = vld [vmem:[#allocation7 + $0x20] sm:$0xff]   ;;  %v428_v17 = vld [vmem:[#allocation7 + $0x28] sm:$0xff]   ;;  %v429_v18 = vld [vmem:[#allocation7 + $0x30] sm:$0xff]  }
  0x3d   :  { %v430_v19 = vld [vmem:[#allocation7 + $0x38] sm:$0xff]   ;;  %v327_v20 = vld [vmem:[%s641_s2] ss:$0 sm:$0xff]  ;;  %p512_p13 = por %p511_p12, %p510_p11 }
  0x3e   :  { %368 = vmatpush3.bf16.msra.mxu0 %v416_v2  ;;  %v338_v40 = vld [vmem:[%s643_s4] ss:$0 sm:$0xff] }
  0x3f   :  { %369 = vmatprep.subr.bf16.mxu0 %v540_v0  ;;  %388 = vmatpush3.bf16.msra.mxu1 %v424_v13  ;;  %p513_p0 = pnand %p512_p13, %p506_p10 }
  0x40   :  { %389 = vmatprep.subr.bf16.mxu1 %v540_v0 }
  0x42   :  { %370 = vmatpush3.bf16.msra.mxu0 %v417_v3 }
  0x43   :  { %371 = vmatprep.subr.bf16.mxu0 %v540_v0  ;;  %390 = vmatpush3.bf16.msra.mxu1 %v425_v14 }
  0x44   :  { %391 = vmatprep.subr.bf16.mxu1 %v540_v0 }
  0x46   :  { %372 = vmatpush3.bf16.msra.mxu0 %v418_v4 }
  0x47   :  { %373 = vmatprep.subr.bf16.mxu0 %v540_v0  ;;  %392 = vmatpush3.bf16.msra.mxu1 %v426_v15 }
  0x48   :  { %393 = vmatprep.subr.bf16.mxu1 %v540_v0 }
  0x4a   :  { %374 = vmatpush3.bf16.msra.mxu0 %v419_v5 }
  0x4b   :  { %375 = vmatprep.subr.bf16.mxu0 %v540_v0  ;;  %394 = vmatpush3.bf16.msra.mxu1 %v427_v16 }
  0x4c   :  { %395 = vmatprep.subr.bf16.mxu1 %v540_v0 }
  0x4e   :  { %376 = vmatpush3.bf16.msra.mxu0 %v420_v6 }
  0x4f   :  { %377 = vmatprep.subr.bf16.mxu0 %v540_v0  ;;  %396 = vmatpush3.bf16.msra.mxu1 %v428_v17 }
  0x50   :  { %397 = vmatprep.subr.bf16.mxu1 %v540_v0 }
  0x52   :  { %378 = vmatpush3.bf16.msra.mxu0 %v421_v7 }
  0x53   :  { %379 = vmatprep.subr.bf16.mxu0 %v540_v0  ;;  %398 = vmatpush3.bf16.msra.mxu1 %v429_v18 }
  0x54   :  { %399 = vmatprep.subr.bf16.mxu1 %v540_v0 }
  0x56   :  { %380 = vmatpush3.bf16.msra.mxu0 %v422_v8 }
  0x57   :  { %400 = vmatpush3.bf16.msra.mxu1 %v430_v19 }
  0x59   :  { %382 = vmatmul.mubr.bf16.vlgmr.msra.gmra.mrb[0].mxu0 %v65_v11 }
 0x12c   :  { %v171_v21 = vpop.f32.mrb[0].mxu0 }
 0x12d   :  { %v172_v22 = vadd.f32 %v327_v20, %v171_v21  ;;  %v383_v23 = vpop.f32.mrb[1].mxu0 }
 0x12e   :  { %v174_v24 = vpop.f32.mrb[2].mxu0 }
 0x12f   :  { %v336_v25 = vmul.f32 -1.702, %v172_v22  ;;  %v175_v26 = vadd.f32 %v327_v20, %v174_v24  ;;  %v384_v27 = vpop.f32.mrb[3].mxu0 }
 0x131   :  { %v182_v28 = vmul.f32 1.442695, %v336_v25  ;;  %v337_v29 = vmul.f32 -1.702, %v175_v26 }
 0x133   :  { %431 = vpow2.f32 %v182_v28  ;;  %v184_v30 = vmul.f32 1.442695, %v337_v29 }
 0x135   :  { %433 = vpow2.f32 %v184_v30 }
 0x13d   :  { %v432_v31 = vpop.eup %431 }
 0x13e   :  { %v186_v32 = vadd.f32 1.0, %v432_v31 }
 0x13f   :  { %v434_v33 = vpop.eup %433 }
 0x140   :  { %435 = vrcp.f32 %v186_v32  ;;  %v187_v34 = vadd.f32 1.0, %v434_v33 }
 0x142   :  { %437 = vrcp.f32 %v187_v34 }
 0x14a   :  { %v436_v35 = vpop.eup %435 }
 0x14b   :  { %v192_v37 = vmul.f32 %v436_v35, %v172_v22 }
 0x14c   :  { %v438_v36 = vpop.eup %437 }
 0x14d   :  { %v193_v38 = vmul.f32 %v438_v36, %v175_v26 }
 0x14f   :  { %v194_v39 = vpack.c.bf16 %v193_v38, %v192_v37 }
 0x151   :  { %402 = vmatmul.mubr.bf16.vlgmr.msra.gmra.mrb[0].mxu1 %v194_v39 }
 0x224   :  { %v300_v41 = vpop.f32.mrb[0].mxu1 }
 0x225   :  { %v301_v42 = vadd.f32 %v338_v40, %v300_v41  ;;  %v403_v43 = vpop.f32.mrb[1].mxu1 }
 0x226   :  { %v303_v44 = vpop.f32.mrb[2].mxu1 }
 0x227   :  { %307 = vst [vmem:[#allocation8] sm:$0xff] %v301_v42  ;;  %v304_v45 = vadd.f32 %v338_v40, %v303_v44  ;;  %v404_v46 = vpop.f32.mrb[3].mxu1 }
 0x229   :  { %308 = vst [vmem:[#allocation8 + $0x8] sm:$0xff] %v304_v45 }
 0x22a   :  { %516 = shalt.err (!%p513_p0)
}
 0x22b   :  { %s517_s12 = scalar_lea.hbm %s644_s5, 256 }
 0x22c   :  { %p518_p1 = scmp.ne.s32.totalorder %s644_s5, %s517_s12  ;;  %p521_p2 = scmp.lt.u32.totalorder %s517_s12, %s644_s5 }
 0x22e   :  { %p523_p3 = pnand %p521_p2, %p518_p1 }
 0x230   :  { %526 = shalt.err (!%p523_p3)
}
 0x231   :  { %320 = dma.vmem_to_hbm [thread:$0]  %s315_s9, 256, %s644_s5, [#allocation4], %s537_s1, %s537_s1, %s538_s17  }
 0x232   :  { %531 = dma.done.wait [#allocation4], 256  }
 0x233   :  { %532 = vsyncadd [#allocation4], 4294967040 }
 0x234   :  { %324 = vsyncpa [#allocation3], 1 }
 0x235   :  { %325 = vsyncpa [#allocation6], 1 }
 0x236   :  { %326 = vsyncpa [#allocation4], 1 }

</bundles_post_ra>
